<compile_context>
chip_gen: v6e
topology: v6e:2x2x1
jax: 0.10.0
libtpu: 0.0.40
codegen_flags: <defaults>
</compile_context>

<pallas_src>
import math
import jax
import jax.numpy as jnp
from jax import lax
from jax.experimental import pallas as pl
from jax.experimental.pallas import tpu as pltpu


def make_mha_kernel(num_heads, head_dim, tq, T):
    d_out = num_heads * head_dim
    scale = 1.0 / math.sqrt(head_dim)

    def mha_kernel(xq_ref, xkv_ref, wq_ref, wk_ref, wv_ref, wo_ref, bo_ref, o_ref):
        # xq_ref : (1, tq, d_in)  query tile of one batch element
        # xkv_ref: (1, T,  d_in)  full sequence of the same batch element
        q_start = pl.program_id(1) * tq

        xq = xq_ref[0].astype(jnp.bfloat16)      # (tq, d_in)
        xkv = xkv_ref[0].astype(jnp.bfloat16)    # (T,  d_in)

        # ---- QKV projections: bf16 operands on the MXU, f32 accumulation ----
        q = jnp.dot(xq, wq_ref[...], preferred_element_type=jnp.float32)   # (tq, d_out)
        k = jnp.dot(xkv, wk_ref[...], preferred_element_type=jnp.float32)  # (T,  d_out)
        v = jnp.dot(xkv, wv_ref[...], preferred_element_type=jnp.float32)  # (T,  d_out)

        # head-major layout (H, t, hd) so all heads go through one batched dot
        qh = q.reshape(tq, num_heads, head_dim).transpose(1, 0, 2).astype(jnp.bfloat16)
        kh = k.reshape(T, num_heads, head_dim).transpose(1, 0, 2).astype(jnp.bfloat16)
        vh = v.reshape(T, num_heads, head_dim).transpose(1, 0, 2).astype(jnp.bfloat16)

        # ---- attention scores: one batched contraction, no explicit K^T ----
        s = jnp.einsum("hqd,hkd->hqk", qh, kh,
                       preferred_element_type=jnp.float32) * scale          # (H, tq, T)

        # causal mask for this query tile (hoisted, built from program_id offset)
        row = q_start + lax.broadcasted_iota(jnp.int32, (tq, T), 0)
        col = lax.broadcasted_iota(jnp.int32, (tq, T), 1)
        keep = (col <= row)[None, :, :]                                      # (1, tq, T)

        # ---- softmax in f32; divide replaced by EUP approx reciprocal ----
        s = jnp.where(keep, s, -jnp.inf)
        m = jnp.max(s, axis=-1, keepdims=True)
        p = jnp.exp(s - m)
        l = jnp.sum(p, axis=-1, keepdims=True)
        p = p * pl.reciprocal(l, approx=True)

        # ---- context: batched over heads, bf16 operands, f32 accumulation ----
        ctx = jnp.einsum("hqk,hkd->hqd", p.astype(jnp.bfloat16), vh,
                         preferred_element_type=jnp.float32)                 # (H, tq, hd)

        # fold heads back to a lane-dense (tq, d_out) slab (registers only,
        # no narrow masked stores), then one 2-D output-projection matmul.
        ctx_flat = ctx.transpose(1, 0, 2).reshape(tq, d_out).astype(jnp.bfloat16)
        out = jnp.dot(ctx_flat, wo_ref[...], preferred_element_type=jnp.float32)
        out = out + bo_ref[...].astype(jnp.float32)                          # (1, d_out) bcast
        o_ref[0] = out.astype(o_ref.dtype)

    return mha_kernel


def multi_head_attention(x, wq, wk, wv, wo, bo, *, num_heads, tq=None):
    """x: (B, T, d_in); wq/wk/wv: (d_in, d_out); wo: (d_out, d_out); bo: (1, d_out)."""
    B, T, d_in = x.shape
    d_out = wq.shape[1]
    assert d_out % num_heads == 0, "d_out must be divisible by num_heads"
    head_dim = d_out // num_heads

    # query-tile size: whole sequence for small T, 256/128-wide tiles otherwise
    if tq is None:
        if T > 256 and T % 256 == 0:
            tq = 256
        elif T > 128 and T % 128 == 0:
            tq = 128
        else:
            tq = T
    nq = T // tq

    # bf16 weights for full-rate MXU; accumulation stays f32 inside the kernel
    wq_b = wq.astype(jnp.bfloat16)
    wk_b = wk.astype(jnp.bfloat16)
    wv_b = wv.astype(jnp.bfloat16)
    wo_b = wo.astype(jnp.bfloat16)

    kernel = make_mha_kernel(num_heads, head_dim, tq, T)

    return pl.pallas_call(
        kernel,
        out_shape=jax.ShapeDtypeStruct((B, T, d_out), x.dtype),
        grid_spec=pltpu.PrefetchScalarGridSpec(
            num_scalar_prefetch=0,
            grid=(B, nq),
            in_specs=[
                pl.BlockSpec((1, tq, d_in), lambda b, qi: (b, qi, 0)),   # x -> Q tile
                pl.BlockSpec((1, T, d_in), lambda b, qi: (b, 0, 0)),     # x -> K/V (full seq)
                pl.BlockSpec((d_in, d_out), lambda b, qi: (0, 0)),       # Wq
                pl.BlockSpec((d_in, d_out), lambda b, qi: (0, 0)),       # Wk
                pl.BlockSpec((d_in, d_out), lambda b, qi: (0, 0)),       # Wv
                pl.BlockSpec((d_out, d_out), lambda b, qi: (0, 0)),      # Wo
                pl.BlockSpec((1, d_out), lambda b, qi: (0, 0)),          # bo
            ],
            out_specs=pl.BlockSpec((1, tq, d_out), lambda b, qi: (b, qi, 0)),
        ),
        compiler_params=pltpu.CompilerParams(
            dimension_semantics=("parallel", "parallel")),
    )(x, x, wq_b, wk_b, wv_b, wo_b, bo)


def mha_reference(x, wq, wk, wv, wo, bo, *, num_heads):
    """Plain-JAX f32 reference mirroring the PyTorch forward exactly."""
    B, T, d_in = x.shape
    d_out = wq.shape[1]
    hd = d_out // num_heads
    q = x @ wq
    k = x @ wk
    v = x @ wv
    q = q.reshape(B, T, num_heads, hd).transpose(0, 2, 1, 3)
    k = k.reshape(B, T, num_heads, hd).transpose(0, 2, 1, 3)
    v = v.reshape(B, T, num_heads, hd).transpose(0, 2, 1, 3)
    scores = jnp.einsum("bhqd,bhkd->bhqk", q, k)
    mask = jnp.triu(jnp.ones((T, T), dtype=bool), k=1)
    scores = jnp.where(mask, -jnp.inf, scores)
    weights = jax.nn.softmax(scores / math.sqrt(hd), axis=-1)
    ctx = jnp.einsum("bhqk,bhkd->bhqd", weights, v)
    ctx = ctx.transpose(0, 2, 1, 3).reshape(B, T, d_out)
    return ctx @ wo + bo


if __name__ == "__main__":
    B, T, d_in, d_out, num_heads = 2, 8, 32, 32, 4
    key = jax.random.PRNGKey(0)
    kx, kq, kk, kv, ko, kb = jax.random.split(key, 6)

    x = jax.random.normal(kx, (B, T, d_in), dtype=jnp.float32)
    # deterministic param init (Linear weights stored pre-transposed: (in, out))
    wq = jax.random.normal(kq, (d_in, d_out), dtype=jnp.float32) * (1.0 / math.sqrt(d_in))
    wk = jax.random.normal(kk, (d_in, d_out), dtype=jnp.float32) * (1.0 / math.sqrt(d_in))
    wv = jax.random.normal(kv, (d_in, d_out), dtype=jnp.float32) * (1.0 / math.sqrt(d_in))
    wo = jax.random.normal(ko, (d_out, d_out), dtype=jnp.float32) * (1.0 / math.sqrt(d_out))
    bo = jax.random.normal(kb, (1, d_out), dtype=jnp.float32) * 0.01

    out = multi_head_attention(x, wq, wk, wv, wo, bo, num_heads=num_heads)
    out = jax.block_until_ready(out)

    ref = mha_reference(x, wq, wk, wv, wo, bo, num_heads=num_heads)
    assert out.shape == (B, T, d_out)
    # bf16 MXU operands + approx reciprocal -> compare against the f32
    # reference with a correspondingly looser tolerance.
    assert jnp.allclose(out, ref, atol=5e-2, rtol=5e-2), "mismatch vs reference"

    print("KERNEL_OK")
</pallas_src>

<mosaic_0001>
module attributes {stable_mosaic.version = 11 : i64} {
  func.func @mha_kernel(%arg0: i32, %arg1: i32, %arg2: memref<1x8x32xf32, #tpu.memory_space<vmem>>, %arg3: memref<1x8x32xf32, #tpu.memory_space<vmem>>, %arg4: memref<32x32xbf16, #tpu.memory_space<vmem>>, %arg5: memref<32x32xbf16, #tpu.memory_space<vmem>>, %arg6: memref<32x32xbf16, #tpu.memory_space<vmem>>, %arg7: memref<32x32xbf16, #tpu.memory_space<vmem>>, %arg8: memref<1x32xf32, #tpu.memory_space<vmem>>, %arg9: memref<1x8x32xf32, #tpu.memory_space<vmem>>) attributes {dimension_semantics = [#tpu.dimension_semantics<parallel>, #tpu.dimension_semantics<parallel>], iteration_bounds = array<i64: 2, 1>, scalar_prefetch = 0 : i64, scratch_operands = 0 : i64, tpu.core_type = #tpu.core_type<tc>, window_params = [{transform_indices = @transform_0, window_bounds = array<i64: 1, 8, 32>}, {transform_indices = @transform_1, window_bounds = array<i64: 1, 8, 32>}, {pipeline_mode = #tpu.pipeline_mode<synchronous>, transform_indices = @transform_2, window_bounds = array<i64: 32, 32>}, {pipeline_mode = #tpu.pipeline_mode<synchronous>, transform_indices = @transform_3, window_bounds = array<i64: 32, 32>}, {pipeline_mode = #tpu.pipeline_mode<synchronous>, transform_indices = @transform_4, window_bounds = array<i64: 32, 32>}, {pipeline_mode = #tpu.pipeline_mode<synchronous>, transform_indices = @transform_5, window_bounds = array<i64: 32, 32>}, {pipeline_mode = #tpu.pipeline_mode<synchronous>, transform_indices = @transform_6, window_bounds = array<i64: 1, 32>}, {transform_indices = @transform_7, window_bounds = array<i64: 1, 8, 32>}]} {
    %c8_i32 = arith.constant 8 : i32
    %0 = arith.muli %arg1, %c8_i32 : i32
    %c0 = arith.constant 0 : index
    %c0_0 = arith.constant 0 : index
    %c0_1 = arith.constant 0 : index
    %1 = vector.load %arg2[%c0, %c0_0, %c0_1] : memref<1x8x32xf32, #tpu.memory_space<vmem>>, vector<1x8x32xf32>
    %2 = vector.shape_cast %1 : vector<1x8x32xf32> to vector<8x32xf32>
    %3 = arith.truncf %2 : vector<8x32xf32> to vector<8x32xbf16>
    %c0_2 = arith.constant 0 : index
    %c0_3 = arith.constant 0 : index
    %c0_4 = arith.constant 0 : index
    %4 = vector.load %arg3[%c0_2, %c0_3, %c0_4] : memref<1x8x32xf32, #tpu.memory_space<vmem>>, vector<1x8x32xf32>
    %5 = vector.shape_cast %4 : vector<1x8x32xf32> to vector<8x32xf32>
    %6 = arith.truncf %5 : vector<8x32xf32> to vector<8x32xbf16>
    %c0_5 = arith.constant 0 : index
    %c0_6 = arith.constant 0 : index
    %7 = vector.load %arg4[%c0_5, %c0_6] : memref<32x32xbf16, #tpu.memory_space<vmem>>, vector<32x32xbf16>
    %cst = arith.constant dense<0.000000e+00> : vector<8x32xf32>
    %8 = tpu.matmul %3, %7, %cst {dimension_numbers = #tpu.dot_dimension_numbers<[1], [0], [0], [1], [0, 0, 1, 1], [], []>} : vector<8x32xbf16>, vector<32x32xbf16>, vector<8x32xf32> -> vector<8x32xf32>
    %c0_7 = arith.constant 0 : index
    %c0_8 = arith.constant 0 : index
    %9 = vector.load %arg5[%c0_7, %c0_8] : memref<32x32xbf16, #tpu.memory_space<vmem>>, vector<32x32xbf16>
    %cst_9 = arith.constant dense<0.000000e+00> : vector<8x32xf32>
    %10 = tpu.matmul %6, %9, %cst_9 {dimension_numbers = #tpu.dot_dimension_numbers<[1], [0], [0], [1], [0, 0, 1, 1], [], []>} : vector<8x32xbf16>, vector<32x32xbf16>, vector<8x32xf32> -> vector<8x32xf32>
    %c0_10 = arith.constant 0 : index
    %c0_11 = arith.constant 0 : index
    %11 = vector.load %arg6[%c0_10, %c0_11] : memref<32x32xbf16, #tpu.memory_space<vmem>>, vector<32x32xbf16>
    %cst_12 = arith.constant dense<0.000000e+00> : vector<8x32xf32>
    %12 = tpu.matmul %6, %11, %cst_12 {dimension_numbers = #tpu.dot_dimension_numbers<[1], [0], [0], [1], [0, 0, 1, 1], [], []>} : vector<8x32xbf16>, vector<32x32xbf16>, vector<8x32xf32> -> vector<8x32xf32>
    %13 = vector.shape_cast %8 : vector<8x32xf32> to vector<8x4x8xf32>
    %14 = tpu.transpose %13, [1, 0, 2] : vector<8x4x8xf32> -> vector<4x8x8xf32>
    %15 = arith.truncf %14 : vector<4x8x8xf32> to vector<4x8x8xbf16>
    %16 = vector.shape_cast %10 : vector<8x32xf32> to vector<8x4x8xf32>
    %17 = tpu.transpose %16, [1, 0, 2] : vector<8x4x8xf32> -> vector<4x8x8xf32>
    %18 = arith.truncf %17 : vector<4x8x8xf32> to vector<4x8x8xbf16>
    %19 = vector.shape_cast %12 : vector<8x32xf32> to vector<8x4x8xf32>
    %20 = tpu.transpose %19, [1, 0, 2] : vector<8x4x8xf32> -> vector<4x8x8xf32>
    %21 = arith.truncf %20 : vector<4x8x8xf32> to vector<4x8x8xbf16>
    "tpu.trace_start"() <{level = 10 : i32, message = "hqd,hkd->hqk"}> : () -> ()
    %cst_13 = arith.constant dense<0.000000e+00> : vector<4x8x8xf32>
    %22 = tpu.matmul %15, %18, %cst_13 {dimension_numbers = #tpu.dot_dimension_numbers<[2], [2], [1], [1], [0, 0, 0, 1, 1, 1], [0], [0]>} : vector<4x8x8xbf16>, vector<4x8x8xbf16>, vector<4x8x8xf32> -> vector<4x8x8xf32>
    "tpu.trace_stop"() : () -> ()
    %cst_14 = arith.constant 0.353553385 : f32
    %23 = vector.broadcast %cst_14 : f32 to vector<4x8x8xf32>
    %24 = arith.mulf %22, %23 : vector<4x8x8xf32>
    %25 = tpu.iota {dimensions = array<i32: 0>} : vector<8x8xi32>
    %26 = vector.broadcast %0 : i32 to vector<8x8xi32>
    %27 = arith.addi %26, %25 : vector<8x8xi32>
    %28 = tpu.iota {dimensions = array<i32: 1>} : vector<8x8xi32>
    %29 = arith.cmpi sle, %28, %27 : vector<8x8xi32>
    %30 = vector.shape_cast %29 : vector<8x8xi1> to vector<1x8x8xi1>
    %cst_15 = arith.constant 0xFF800000 : f32
    %31 = vector.shape_cast %30 : vector<1x8x8xi1> to vector<1x8x8xi1>
    %32 = vector.broadcast %31 : vector<1x8x8xi1> to vector<4x8x8xi1>
    %33 = vector.broadcast %cst_15 : f32 to vector<4x8x8xf32>
    %34 = arith.select %32, %24, %33 : vector<4x8x8xi1>, vector<4x8x8xf32>
    %cst_16 = arith.constant dense<0xFF800000> : vector<4x8xf32>
    %35 = vector.multi_reduction <maximumf>, %34, %cst_16 [2] : vector<4x8x8xf32> to vector<4x8xf32>
    %36 = vector.shape_cast %35 : vector<4x8xf32> to vector<4x8x1xf32>
    %37 = vector.broadcast %36 : vector<4x8x1xf32> to vector<4x8x8xf32>
    %38 = arith.subf %34, %37 : vector<4x8x8xf32>
    %39 = math.exp %38 : vector<4x8x8xf32>
    %cst_17 = arith.constant dense<0.000000e+00> : vector<4x8xf32>
    %40 = vector.multi_reduction <add>, %39, %cst_17 [2] : vector<4x8x8xf32> to vector<4x8xf32>
    %41 = vector.shape_cast %40 : vector<4x8xf32> to vector<4x8x1xf32>
    %42 = tpu.reciprocal %41 {approx = true} : vector<4x8x1xf32> -> vector<4x8x1xf32>
    %43 = vector.broadcast %42 : vector<4x8x1xf32> to vector<4x8x8xf32>
    %44 = arith.mulf %39, %43 : vector<4x8x8xf32>
    %45 = arith.truncf %44 : vector<4x8x8xf32> to vector<4x8x8xbf16>
    "tpu.trace_start"() <{level = 10 : i32, message = "hqk,hkd->hqd"}> : () -> ()
    %cst_18 = arith.constant dense<0.000000e+00> : vector<4x8x8xf32>
    %46 = tpu.matmul %45, %21, %cst_18 {dimension_numbers = #tpu.dot_dimension_numbers<[2], [1], [1], [2], [0, 0, 0, 1, 1, 2], [0], [0]>} : vector<4x8x8xbf16>, vector<4x8x8xbf16>, vector<4x8x8xf32> -> vector<4x8x8xf32>
    "tpu.trace_stop"() : () -> ()
    %47 = tpu.transpose %46, [1, 0, 2] : vector<4x8x8xf32> -> vector<8x4x8xf32>
    %48 = vector.shape_cast %47 : vector<8x4x8xf32> to vector<8x32xf32>
    %49 = arith.truncf %48 : vector<8x32xf32> to vector<8x32xbf16>
    %c0_19 = arith.constant 0 : index
    %c0_20 = arith.constant 0 : index
    %50 = vector.load %arg7[%c0_19, %c0_20] : memref<32x32xbf16, #tpu.memory_space<vmem>>, vector<32x32xbf16>
    %cst_21 = arith.constant dense<0.000000e+00> : vector<8x32xf32>
    %51 = tpu.matmul %49, %50, %cst_21 {dimension_numbers = #tpu.dot_dimension_numbers<[1], [0], [0], [1], [0, 0, 1, 1], [], []>} : vector<8x32xbf16>, vector<32x32xbf16>, vector<8x32xf32> -> vector<8x32xf32>
    %c0_22 = arith.constant 0 : index
    %c0_23 = arith.constant 0 : index
    %52 = vector.load %arg8[%c0_22, %c0_23] : memref<1x32xf32, #tpu.memory_space<vmem>>, vector<1x32xf32>
    %53 = vector.broadcast %52 : vector<1x32xf32> to vector<8x32xf32>
    %54 = arith.addf %51, %53 : vector<8x32xf32>
    %c0_24 = arith.constant 0 : index
    %c0_25 = arith.constant 0 : index
    %c0_26 = arith.constant 0 : index
    %55 = vector.load %arg9[%c0_24, %c0_25, %c0_26] : memref<1x8x32xf32, #tpu.memory_space<vmem>>, vector<1x8x32xf32>
    %56 = vector.shape_cast %55 : vector<1x8x32xf32> to vector<8x32xf32>
    %57 = vector.shape_cast %54 : vector<8x32xf32> to vector<1x8x32xf32>
    tpu.vector_store %arg9[%c0_24, %c0_25, %c0_26], %57 {strides = array<i32>} : memref<1x8x32xf32, #tpu.memory_space<vmem>>, vector<1x8x32xf32>,
    return
  }
  func.func @transform_0(%arg0: i32, %arg1: i32) -> (i32, i32, i32) {
    %c0_i32 = arith.constant 0 : i32
    %c0_i32_0 = arith.constant 0 : i32
    return %arg0, %arg1, %c0_i32 : i32, i32, i32
  }
  func.func @transform_1(%arg0: i32, %arg1: i32) -> (i32, i32, i32) {
    %c0_i32 = arith.constant 0 : i32
    %c0_i32_0 = arith.constant 0 : i32
    %c0_i32_1 = arith.constant 0 : i32
    return %arg0, %c0_i32, %c0_i32_0 : i32, i32, i32
  }
  func.func @transform_2(%arg0: i32, %arg1: i32) -> (i32, i32) {
    %c0_i32 = arith.constant 0 : i32
    %c0_i32_0 = arith.constant 0 : i32
    %c0_i32_1 = arith.constant 0 : i32
    return %c0_i32, %c0_i32_0 : i32, i32
  }
  func.func @transform_3(%arg0: i32, %arg1: i32) -> (i32, i32) {
    %c0_i32 = arith.constant 0 : i32
    %c0_i32_0 = arith.constant 0 : i32
    %c0_i32_1 = arith.constant 0 : i32
    return %c0_i32, %c0_i32_0 : i32, i32
  }
  func.func @transform_4(%arg0: i32, %arg1: i32) -> (i32, i32) {
    %c0_i32 = arith.constant 0 : i32
    %c0_i32_0 = arith.constant 0 : i32
    %c0_i32_1 = arith.constant 0 : i32
    return %c0_i32, %c0_i32_0 : i32, i32
  }
  func.func @transform_5(%arg0: i32, %arg1: i32) -> (i32, i32) {
    %c0_i32 = arith.constant 0 : i32
    %c0_i32_0 = arith.constant 0 : i32
    %c0_i32_1 = arith.constant 0 : i32
    return %c0_i32, %c0_i32_0 : i32, i32
  }
  func.func @transform_6(%arg0: i32, %arg1: i32) -> (i32, i32) {
    %c0_i32 = arith.constant 0 : i32
    %c0_i32_0 = arith.constant 0 : i32
    %c0_i32_1 = arith.constant 0 : i32
    return %c0_i32, %c0_i32_0 : i32, i32
  }
  func.func @transform_7(%arg0: i32, %arg1: i32) -> (i32, i32, i32) {
    %c0_i32 = arith.constant 0 : i32
    %c0_i32_0 = arith.constant 0 : i32
    return %arg0, %arg1, %c0_i32 : i32, i32, i32
  }
}

</mosaic_0001>

<bundles_post_ra>
// kernel: tpu_custom_call.1
= control target key start
LH: loop header
LB: loop body
LE: loop exit
PB: predicated region body
PF: predicated region fallthrough
CT: control target
= control target key end

     0   :  { %s2904_s0 = inlined_call_operand.hbm [shape: f32[2,8,32], index: 0, kind: input, shape index: {}]   ;;  %s2905_s1 = inlined_call_operand.hbm [shape: f32[2,8,32], index: 1, kind: input, shape index: {}]   ;;  %s2906_s2 = inlined_call_operand.hbm [shape: bf16[32,32], index: 2, kind: input, shape index: {}]   ;;  %s2907_s3 = inlined_call_operand.hbm [shape: bf16[32,32], index: 3, kind: input, shape index: {}]   ;;  %s2908_s4 = inlined_call_operand.hbm [shape: bf16[32,32], index: 4, kind: input, shape index: {}]   ;;  %s2909_s5 = inlined_call_operand.hbm [shape: bf16[32,32], index: 5, kind: input, shape index: {}]   ;;  %s2910_s6 = inlined_call_operand.vmem [shape: f32[1,32], index: 6, kind: input, shape index: {}]   ;;  %s2911_s7 = inlined_call_operand.hbm [shape: f32[2,8,32], index: 7, kind: output, shape index: {}]  }
   0x1   :  { %2913 = sst [smem:[#allocation20_spill]] %s2904_s0 }
   0x2   :  { %2914 = sst [smem:[#allocation21_spill]] %s2906_s2 }
   0x3   :  { %2915 = sst [smem:[#allocation22_spill]] %s2907_s3 }
   0x4   :  { %2916 = sst [smem:[#allocation23_spill]] %s2908_s4 }
   0x5   :  { %2917 = sst [smem:[#allocation24_spill]] %s2909_s5 }
   0x6   :  { %12 = vsyncpa [#allocation3], 0 }
   0x7   :  { %14 = vsyncpa [#allocation3 + $0x1], 0 }
   0x8   :  { %15 = vsyncpa [#allocation6], 0 }
   0x9   :  { %17 = vsyncpa [#allocation6 + $0x1], 0 }
   0xa   :  { %18 = vsyncpa [#allocation9], 0 }
   0xb   :  { %19 = vsyncpa [#allocation12], 0 }
   0xc   :  { %20 = vsyncpa [#allocation4], 0 }
   0xd   :  { %22 = vsyncpa [#allocation4 + $0x1], 0  ;;  %s2471_s24 = smov 0   ;;  %s2473_s25 = smov 0  }
   0xe   :  { %s2475_s26 = smov 0   ;;  %s2477_s27 = smov 0  }
   0xf   :  { %s2479_s28 = smov 0   ;;  %s2481_s29 = smov 0  }
  0x10 LB: > { %s2502_s30 = sadd.s32 4294967295, %s2410_s29   ;;  %p1851_p0 = scmp.ge.s32.totalorder %s2410_s29, 1  ;;  %s2410_s29 = sphi %s2481_s29, %s28_s29   ;;  %s2406_s28 = sphi %s2479_s28, %s2941_s28   ;;  %s2402_s27 = sphi %s2477_s27, %s2940_s27   ;;  %s2398_s26 = sphi %s2475_s26, %s2939_s26   ;;  %s2394_s25 = sphi %s2473_s25, %s2938_s25   ;;  %s2390_s24 = sphi %s2471_s24, %s2937_s24  }
  0x11   : > { %p2912_p1 = scmp.eq.s32.totalorder %s2502_s30, 0  ;;  %p232_p2 = scmp.lt.s32.totalorder %s2410_s29, 3 }
  0x12   : > { %s2412_s9 = smov [#allocation7]   ;;  %s2413_s12 = smov [#allocation8]  }
  0x13   : > { %p2507_p3 = pnand %p1851_p0, %p232_p2  ;;  %s244_s10 = sshll.u32 %s2412_s9, 4  ;;  %s245_s10 = int_to_ptr.vmem [resolvable:$true] %s244_s10 }
  0x14   : > { %s257_s13 = sshll.u32 %s2413_s12, 4  ;;  %s2414_s14 = smov [#allocation10]   ;;  %s258_s13 = int_to_ptr.vmem [resolvable:$true] %s257_s13 }
  0x15   : > { %p2032_p4 = pneg %p2507_p3  ;;  %s270_s15 = sshll.u32 %s2414_s14, 4  ;;  %s271_s15 = int_to_ptr.vmem [resolvable:$true] %s270_s15 }
  0x16   : > { %s2165_s16 = scalar_lea.vmem %s245_s10, 256  ;;  %p2173_p11 = scmp.lt.s32.totalorder %s245_s10, %s245_s10 }
  0x17   : > { %p2516_p6 = pnand %p2032_p4, %p2912_p1  ;;  %p2166_p8 = scmp.ne.s32.totalorder %s245_s10, %s2165_s16 }
  0x18   : > { %p2174_p12 = scmp.lt.s32.totalorder %s2165_s16, %s2165_s16 }
  0x19   : > { %p2156_p7 = pneg %p2516_p6 }
  0x1a   : > { %p2175_p13 = por %p2174_p12, %p2173_p11 }
  0x1b   : > { %p2168_p9 = pnand %p2166_p8, %p2156_p7 }
  0x1d   : > { %p2169_p10 = pneg %p2168_p9 }
  0x1f   : > { %p2176_p0 = pnand %p2175_p13, %p2169_p10 }
  0x21   : > { %2179 = shalt.err (!%p2176_p0)
}
  0x22   : > { %s2415_s17 = smov 64   ;;  %s2416_s18 = smov 4  }
  0x23   : > { %s2920_s2 = sld [smem:[#allocation21_spill]]  ;;  %s2191_s21 = scalar_lea.vmem %s258_s13, 256 }
  0x24   : > { %p2192_p2 = scmp.ne.s32.totalorder %s258_s13, %s2191_s21  ;;  %p2199_p9 = scmp.lt.s32.totalorder %s258_s13, %s258_s13 }
  0x25   : > { %p2200_p10 = scmp.lt.s32.totalorder %s2191_s21, %s2191_s21 }
  0x26   : > { %p2194_p4 = pnand %p2192_p2, %p2156_p7 }
  0x27   : > { %p2201_p11 = por %p2200_p10, %p2199_p9 }
  0x28   : > { %p2195_p8 = pneg %p2194_p4 }
  0x29   : > { %2035 = dma.hbm_to_vmem [thread:$0]  (!%p2516_p6), %s2920_s2, 256, %s245_s10, [#allocation6], %s2415_s17, %s2415_s17, %s2416_s18  }
  0x2a   : > { %p2202_p12 = pnand %p2201_p11, %p2195_p8 }
  0x2c   : > { %2205 = shalt.err (!%p2202_p12)
}
  0x2d   : > { %s2921_s3 = sld [smem:[#allocation22_spill]]  ;;  %s2217_s9 = scalar_lea.vmem %s271_s15, 256 }
  0x2e   : > { %p2218_p13 = scmp.ne.s32.totalorder %s271_s15, %s2217_s9  ;;  %p2225_p4 = scmp.lt.s32.totalorder %s271_s15, %s271_s15 }
  0x2f   : > { %p2226_p8 = scmp.lt.s32.totalorder %s2217_s9, %s2217_s9 }
  0x30   : > { %p2220_p0 = pnand %p2218_p13, %p2156_p7 }
  0x31   : > { %p2227_p9 = por %p2226_p8, %p2225_p4 }
  0x32   : > { %p2221_p2 = pneg %p2220_p0 }
  0x33   : > { %2038 = dma.hbm_to_vmem [thread:$0]  (!%p2516_p6), %s2921_s3, 256, %s258_s13, [#allocation9], %s2415_s17, %s2415_s17, %s2416_s18  }
  0x34   : > { %p2228_p10 = pnand %p2227_p9, %p2221_p2 }
  0x36   : > { %2231 = shalt.err (!%p2228_p10)
}
  0x37   : > { %s2922_s4 = sld [smem:[#allocation23_spill]]  ;;  %s2417_s13 = smov [#allocation11]  }
  0x38   : > { %s283_s14 = sshll.u32 %s2417_s13, 4  ;;  %s284_s14 = int_to_ptr.vmem [resolvable:$true] %s283_s14 }
  0x39   : > { %s2243_s16 = scalar_lea.vmem %s284_s14, 256  ;;  %p2251_p0 = scmp.lt.s32.totalorder %s284_s14, %s284_s14 }
  0x3a   : > { %p2244_p11 = scmp.ne.s32.totalorder %s284_s14, %s2243_s16  ;;  %p2252_p2 = scmp.lt.s32.totalorder %s2243_s16, %s2243_s16 }
  0x3c   : > { %p2246_p12 = pnand %p2244_p11, %p2156_p7  ;;  %p2253_p4 = por %p2252_p2, %p2251_p0 }
  0x3d   : > { %2041 = dma.hbm_to_vmem [thread:$0]  (!%p2516_p6), %s2922_s4, 256, %s271_s15, [#allocation9], %s2415_s17, %s2415_s17, %s2416_s18  }
  0x3e   : > { %p2247_p13 = pneg %p2246_p12 }
  0x40   : > { %p2254_p8 = pnand %p2253_p4, %p2247_p13 }
  0x42   : > { %2257 = shalt.err (!%p2254_p8)
}
  0x43   : > { %s2923_s5 = sld [smem:[#allocation24_spill]]  ;;  %s1850_s11 = sadd.s32 4294967294, %s2410_s29  }
  0x44   : > { %s40_s20 = sadd.s32 1, %s2406_s28  ;;  %s49_s21 = sadd.s32 1, %s2398_s26 }
  0x45   : > { %p42_p7 = scmp.ge.s32.totalorder %s40_s20, 2  ;;  %p56_p9 = scmp.ne.s32.totalorder %s2398_s26, %s2394_s25 }
  0x46   : > { %p57_p10 = scmp.eq.s32.totalorder %s2410_s29, 0  ;;  %p62_p12 = scmp.ne.s32.totalorder %s2394_s25, %s2390_s24 }
  0x47   : > { %s2943_s20 = smov (%p42_p7, %s40_s20), 0  ;;  %p225_p4 = scmp.eq.s32.totalorder %s1850_s11, 1 }
  0x48   : > { %p2574_p11 = por %p57_p10, %p56_p9  ;;  %p2585_p0 = por %p2912_p1, %p62_p12 }
  0x49   : > { %2044 = dma.hbm_to_vmem [thread:$0]  (!%p2516_p6), %s2923_s5, 256, %s284_s14, [#allocation12], %s2415_s17, %s2415_s17, %s2416_s18  }
  0x4a   : > { %s44_s17 = ssub.s32 %s2406_s28, %s2943_s20  ;;  %p219_p6 = scmp.eq.s32.totalorder %s2502_s30, 1 }
  0x4b   : > { %p47_p13 = scmp.eq.s32.totalorder %s44_s17, 0  ;;  %p2596_p8 = por %p225_p4, %p62_p12 }
  0x4c   : > { %p2589_p2 = por %p219_p6, %p56_p9  ;;  %p2060_p7 = scmp.lt.s32.totalorder %s2410_s29, 2 }
  0x4d   : > { %s2594_s9 = scalar_select %p47_p13, %s2398_s26, %s49_s21  }
  0x4e   : > { %s300_s12 = sand.u32 1, %s2398_s26   ;;  %s1858_s13 = sshll.u32 %s2406_s28, 7 }
  0x4f   : > { %s1857_s14 = sshll.u32 %s300_s12, 3  ;;  %s2928_s0 = sld [smem:[#allocation20_spill]] }
  0x50   : > { %s304_s17 = scalar_lea.vmem [#allocation2], %s1857_s14  ;;  %p2608_p9 = pnand %p2060_p7, %p2574_p11 }
  0x51   : > { %s312_s2 = sshll.u32 %s304_s17, 4  ;;  %s2615_s4 = scalar_lea.hbm %s2905_s1, %s1858_s13  ;;  %s313_s2 = int_to_ptr.vmem [resolvable:$true] %s312_s2 }
  0x52   : > { %s301_s5 = scalar_lea.sflag [#allocation3], %s300_s12  ;;  %p2260_p10 = pneg %p2608_p9 }
  0x53   : > { %s2271_s16 = scalar_lea.vmem %s313_s2, 128  ;;  %s2418_s22 = smov [#allocation2]  }
  0x54   : > { %p2272_p12 = scmp.ne.s32.totalorder %s313_s2, %s2271_s16  ;;  %s2276_s15 = sshll.u32 %s2418_s22, 4  ;;  %s2277_s15 = int_to_ptr.vmem [resolvable:$false] %s2276_s15 }
  0x55   : > { %s310_s19 = scalar_lea.hbm %s2928_s0, %s1858_s13  ;;  %s2278_s17 = scalar_lea.vmem %s2277_s15, 256 }
  0x56   : > { %p2274_p6 = pnand %p2272_p12, %p2260_p10  ;;  %p2279_p13 = scmp.lt.s32.totalorder %s313_s2, %s2277_s15 }
  0x57   : > { %p2280_p4 = scmp.lt.s32.totalorder %s2278_s17, %s2271_s16 }
  0x58   : > { %p2275_p11 = pneg %p2274_p6 }
  0x59   : > { %p2281_p7 = por %p2280_p4, %p2279_p13 }
  0x5b   : > { %p2282_p5 = pnand %p2281_p7, %p2275_p11 }
  0x5d   : > { %2285 = shalt.err (!%p2282_p5)
}
  0x5e   : > { %2048 = dma.hbm_to_vmem [thread:$0]  (!%p2608_p9), %s310_s19, 128, %s313_s2, %s301_s5  }
  0x5f   : > { %s319_s12 = sand.u32 1, %s2410_s29   ;;  %s323_s13 = scalar_lea.vmem [#allocation5], %s1857_s14 }
  0x60   : > { %s330_s11 = sshll.u32 %s323_s13, 4  ;;  %s320_s21 = scalar_lea.sflag [#allocation6], %s319_s12  ;;  %s331_s11 = int_to_ptr.vmem [resolvable:$true] %s330_s11 }
  0x61   : > { %s2299_s0 = scalar_lea.vmem %s331_s11, 128  ;;  %s2419_s16 = smov [#allocation5]  }
  0x62   : > { %p2300_p12 = scmp.ne.s32.totalorder %s331_s11, %s2299_s0  ;;  %s2304_s22 = sshll.u32 %s2419_s16, 4  ;;  %s2305_s22 = int_to_ptr.vmem [resolvable:$false] %s2304_s22 }
  0x63   : > { %s2306_s15 = scalar_lea.vmem %s2305_s22, 256  ;;  %p2307_p5 = scmp.lt.s32.totalorder %s331_s11, %s2305_s22 }
  0x64   : > { %p2302_p6 = pnand %p2300_p12, %p2260_p10  ;;  %p2308_p11 = scmp.lt.s32.totalorder %s2306_s15, %s2299_s0 }
  0x66   : > { %p2303_p1 = pneg %p2302_p6  ;;  %p2309_p13 = por %p2308_p11, %p2307_p5 }
  0x68   : > { %p2310_p4 = pnand %p2309_p13, %p2303_p1 }
  0x6a   : > { %2313 = shalt.err (!%p2310_p4)
}
  0x6b   : > { %2051 = dma.hbm_to_vmem [thread:$0]  (!%p2608_p9), %s2615_s4, 128, %s331_s11, %s320_s21  }
  0x6c   : > { %339 = sbr.rel (%p2507_p3) target bundleno = 1582 (0x62e), region = 48  ;;  %s2634_s2 = sand.u32 (!%p2507_p3), 1, %s2394_s25  }
  0x6d   : > { %s2637_s5 = sshll.u32 (!%p2507_p3), %s2634_s2, 3  ;;  %s342_s0 = scalar_lea.sflag (!%p2507_p3), [#allocation3], %s2634_s2 }
  0x6e   : > { %s345_s14 = scalar_lea.vmem (!%p2507_p3), [#allocation2], %s2637_s5 }
  0x71   : > { %2365 = dma.done.wait (%p2585_p0), %s342_s0, 128  }
  0x72   : > { %2367 = vsyncadd (%p2585_p0), %s342_s0, 4294967168  ;;  %s350_s3 = sand.u32 1, %s2502_s30   ;;  %s354_s8 = scalar_lea.vmem [#allocation5], %s2637_s5 }
  0x73   : > { %s351_s4 = scalar_lea.sflag [#allocation6], %s350_s3 }
  0x74   : > { %2369 = dma.done.wait (%p2585_p0), %s351_s4, 128  }
  0x75   : > { %2371 = vsyncadd (%p2585_p0), %s351_s4, 4294967168  ;;  %p2930_p1 = scmp.eq.s32.totalorder %s2502_s30, 0 }
  0x77   : > { %2373 = dma.done.wait (%p2930_p1), [#allocation6], 256   ;;  %p2931_p3 = pmov %p2930_p1 }
  0x78   : > { %p2932_p9 = pmov %p2930_p1 }
  0x79   : > { %2375 = vsyncadd (%p2931_p3), [#allocation6], 4294967040 }
  0x7a   : > { %2377 = dma.done.wait (%p2932_p9), [#allocation9], 512   ;;  %p2933_p10 = pmov %p2930_p1 }
  0x7b   : > { %p2934_p7 = pmov %p2930_p1 }
  0x7c   : > { %2379 = vsyncadd (%p2933_p10), [#allocation9], 4294966784 }
  0x7d   : > { %2381 = dma.done.wait (%p2934_p7), [#allocation12], 256   ;;  %p2935_p12 = pmov %p2930_p1 }
  0x7e   : > { %v2420_v0 = vmov 0.0   ;;  %vm2421_vm0 = vmmov 0   ;;  %v2130_v1 = vld [vmem:[#allocation8 + $0x8] sm:$0xff]   ;;  %v2131_v2 = vld [vmem:[#allocation7 + $0x8] sm:$0xff]   ;;  %v2132_v3 = vld [vmem:[#allocation8] sm:$0xff]   ;;  %vm428_vm1 = vcmask 261120   ;;  %v602_v21 = vlaneseq }
  0x7f   : > { %2383 = vsyncadd (%p2935_p12), [#allocation12], 4294967040  ;;  %1938 = vmatprep.subr.bf16.mxu1 %v2420_v0  ;;  %1930 = vmatprep.subr.bf16.mxu0 %v2420_v0  ;;  %v2133_v4 = vld [vmem:[#allocation7] sm:$0xff]   ;;  %v410_v5 = vld [vmem:[%s354_s8] sm:$0xff]  ;;  %s2422_s30 = smov 104   ;;  %s2423_s18 = smov 120  }
  0x80   : > { %1942 = vmatprep.mubr.msk.bf16.mxu1 %vm2421_vm0, %v2420_v0  ;;  %1934 = vmatprep.mubr.msk.bf16.mxu0 %vm2421_vm0, %v2420_v0  ;;  %v408_v6 = vld [vmem:[%s345_s14] sm:$0xff]  ;;  %v411_v7 = vpack.c.bf16 %v410_v5, %v410_v5  ;;  %s2424_s19 = smov 112   ;;  %v2425_v19 = vmov 1983009808   ;;  %v2426_v22 = vmov 1934713408  }
  0x81   : > { %1939 = vmatpush3.bf16.msra.mxu1 %v2130_v1  ;;  %1931 = vmatpush3.bf16.msra.mxu0 %v2131_v2  ;;  %v409_v8 = vpack.c.bf16 %v408_v6, %v408_v6  ;;  %v2134_v9 = vld [vmem:[#allocation10 + $0x8] sm:$0xff]   ;;  %v2135_v13 = vld [vmem:[#allocation10] sm:$0xff]   ;;  %v600_v20 = vunpack.c.l.s4 %v2425_v19  ;;  %v632_v23 = vunpack.c.l.s4 %v2426_v22  ;;  %v2691_v25 = vshrl.u32 %v602_v21, 7  ;;  %s2427_s17 = smov 16   ;;  %s2428_s12 = smov 8  }
  0x82   : > { %1940 = vmatprep.subr.bf16.mxu1 %v2420_v0  ;;  %1932 = vmatprep.subr.bf16.mxu0 %v2420_v0  ;;  %vm1037_vm2 = vcmask 64512   ;;  %vm1290_vm4 = vcmask 1043456   ;;  %s2429_s13 = smov 24   ;;  %vm1621_vm5 = vcmask 130048   ;;  %vm1623_vm6 = vcmask 195584   ;;  %s1899_s16 = sshll.u32 %s2402_s27, 7 }
  0x83   : > { %v601_v24 = vunpack.c.0.s8 %v600_v20  ;;  %v633_v28 = vunpack.c.0.s8 %v632_v23  ;;  %s405_s22 = scalar_lea.vmem [#allocation13], %s2637_s5  ;;  %s2855_s3 = scalar_lea.hbm %s2911_s7, %s1899_s16 }
  0x84   : > { %s1708_s15 = sshll.u32 %s405_s22, 4  ;;  %s1694_s4 = scalar_lea.sflag [#allocation4], %s2634_s2  ;;  %s2857_s15 = int_to_ptr.vmem [resolvable:$true] %s1708_s15 }
  0x85   : > { %1941 = vmatpush3.bf16.msra.mxu1 %v2132_v3  ;;  %1933 = vmatpush3.bf16.msra.mxu0 %v2133_v4  ;;  %v2694_v29 = vsub.s32 %v601_v24, %v2691_v25  ;;  %v2697_v36 = vsub.s32 %v633_v28, %v2691_v25  ;;  %s2314_s27 = scalar_lea.vmem %s2857_s15, 128  ;;  %s2430_s5 = smov [#allocation13]  }
  0x86   : > { %1954 = vmatprep.subr.bf16.mxu1 %v2420_v0  ;;  %1946 = vmatprep.subr.bf16.mxu0 %v2420_v0  ;;  %p2315_p0 = scmp.ne.s32.totalorder %s2857_s15, %s2314_s27  ;;  %s2318_s8 = sshll.u32 %s2430_s5, 4  ;;  %s2319_s8 = int_to_ptr.vmem [resolvable:$false] %s2318_s8 }
  0x87   : > { %p2321_p11 = scmp.lt.s32.totalorder %s2857_s15, %s2319_s8 }
  0x88   : > { %1943 = vmatmul.mubr.msk.bf16.vlgmr.msra.gmra.mxu1 %vm428_vm1, %v411_v7  ;;  %1935 = vmatmul.mubr.msk.bf16.vlgmr.msra.gmra.mxu0 %vm428_vm1, %v409_v8  ;;  %p2316_p6 = pnand %p2315_p0, %p2589_p2 }
  0x89   : > { %1956 = vmatprep.mubr.msk.bf16.mxu1 %vm2421_vm0, %v2420_v0  ;;  %1950 = vmatprep.mubr.msk.bf16.mxu0 %vm2421_vm0, %v2420_v0 }
  0x8a   : > { %1947 = vmatpush3.bf16.msra.mxu0 %v2134_v9  ;;  %p2317_p5 = pneg %p2316_p6 }
  0x8b   : > { %1948 = vmatprep.subr.bf16.mxu0 %v2420_v0 }
  0x8e   : > { %1949 = vmatpush3.bf16.msra.mxu0 %v2135_v13 }
  0x8f   : > { %1960 = vmatprep.subr.bf16.mxu0 %v2420_v0 }
  0x91   : > { %1951 = vmatmul.mubr.msk.bf16.vlgmr.msra.gmra.mxu0 %vm428_vm1, %v411_v7 }
  0x92   : > { %1962 = vmatprep.mubr.msk.bf16.mxu0 %vm2421_vm0, %v2420_v0 }
 0x148   : > { %v525_v10 = vpop.f32.mrf.mxu1  ;;  %v466_v11 = vpop.f32.mrf.mxu0 }
 0x149   : > { %744 = vrot.lane.b32.xlu1 %v525_v10, %s2422_s30  ;;  %738 = vrot.lane.b32.xlu0 %v525_v10, %s2423_s18 }
 0x14a   : > { %v1944_v12 = vpop.f32.mrf.mxu1  ;;  %v1936_v14 = vpop.f32.mrf.mxu0 }
 0x14c   : > { %v528_v15 = vpop.f32.mrf.mxu1  ;;  %v469_v16 = vpop.f32.mrf.mxu0 }
 0x14d   : > { %741 = vrot.lane.b32.xlu0 %v525_v10, %s2424_s19  ;;  %588 = vrot.lane.b32.xlu1 %v466_v11, %s2423_s18 }
 0x14e   : > { %v1945_v17 = vpop.f32.mrf.mxu1  ;;  %v1937_v18 = vpop.f32.mrf.mxu0 }
 0x151   : > { %591 = vrot.lane.b32.xlu0 %v466_v11, %s2424_s19  ;;  %594 = vrot.lane.b32.xlu1 %v466_v11, %s2422_s30 }
 0x1bb   : > { %v745_v26 = vpop.permute.xlu1 %744  ;;  %v739_v27 = vpop.permute.xlu0 %738 }
 0x1bc   : > { %v763_v30 = vcombine.low %v739_v27, %v745_v26  ;;  %v764_v31 = vcombine.high %v739_v27, %v745_v26 }
 0x1be   : > { %v771_v37 = vrot.slane %v763_v30, %v2694_v29  ;;  %v778_v38 = vrot.slane %v764_v31, %v2694_v29 }
 0x1bf   : > { %v742_v32 = vpop.permute.xlu0 %741  ;;  %v589_v33 = vpop.permute.xlu1 %588 }
 0x1c0   : > { %v747_v34 = vcombine.low %v525_v10, %v742_v32  ;;  %v748_v35 = vcombine.high %v525_v10, %v742_v32 }
 0x1c2   : > { %v755_v39 = vrot.slane %v747_v34, %v2694_v29  ;;  %v762_v40 = vrot.slane %v748_v35, %v2694_v29 }
 0x1c3   : > { %v592_v41 = vpop.permute.xlu0 %591  ;;  %v595_v42 = vpop.permute.xlu1 %594 }
 0x1c4   : > { %v779_v43 = vcombine.low %v755_v39, %v771_v37  ;;  %v780_v44 = vcombine.high %v755_v39, %v771_v37  ;;  %v795_v45 = vcombine.low %v762_v40, %v778_v38  ;;  %v796_v46 = vcombine.high %v762_v40, %v778_v38 }
 0x1c5   : > { %v597_v47 = vcombine.low %v466_v11, %v592_v41  ;;  %v598_v48 = vcombine.high %v466_v11, %v592_v41  ;;  %v613_v49 = vcombine.low %v589_v33, %v595_v42  ;;  %v614_v50 = vcombine.high %v589_v33, %v595_v42 }
 0x1c6   : > { %v787_v51 = vrot.slane %v779_v43, %v2697_v36  ;;  %v794_v52 = vrot.slane %v780_v44, %v2697_v36  ;;  %v803_v53 = vrot.slane %v795_v45, %v2697_v36  ;;  %v810_v54 = vrot.slane %v796_v46, %v2697_v36 }
 0x1c7   : > { %v605_v55 = vrot.slane %v597_v47, %v2694_v29  ;;  %v612_v56 = vrot.slane %v598_v48, %v2694_v29  ;;  %v621_v57 = vrot.slane %v613_v49, %v2694_v29  ;;  %v628_v58 = vrot.slane %v614_v50, %v2694_v29 }
 0x1c8   : > { %v815_v59 = vcombine.low %v787_v51, %v794_v52  ;;  %v1880_v60 = vcombine.high %v787_v51, %v794_v52  ;;  %v831_v61 = vcombine.low %v803_v53, %v810_v54  ;;  %v1881_v62 = vcombine.high %v803_v53, %v810_v54 }
 0x1c9   : > { %v629_v63 = vcombine.low %v605_v55, %v621_v57  ;;  %v630_v1 = vcombine.high %v605_v55, %v621_v57  ;;  %v645_v2 = vcombine.low %v612_v56, %v628_v58  ;;  %v646_v3 = vcombine.high %v612_v56, %v628_v58 }
 0x1ca   : > { %v822_v4 = vrot.slane %v815_v59, %v2694_v29  ;;  %v830_v5 = vrot.slane %v1880_v60, %v2694_v29  ;;  %v838_v6 = vrot.slane %v831_v61, %v2694_v29  ;;  %v846_v7 = vrot.slane %v1881_v62, %v2694_v29  ;;  %v2751_v60 = vpop.f32.mrf.mxu0 }
 0x1cb   : > { %v637_v8 = vrot.slane %v629_v63, %v2697_v36  ;;  %v644_v9 = vrot.slane %v630_v1, %v2697_v36  ;;  %v653_v10 = vrot.slane %v645_v2, %v2697_v36  ;;  %v660_v11 = vrot.slane %v646_v3, %v2697_v36 }
 0x1cc   : > { %v847_v12 = vcombine.low %v822_v4, %v830_v5  ;;  %v863_v13 = vcombine.low %v838_v6, %v846_v7  ;;  %v848_v14 = vcombine.high %v822_v4, %v830_v5  ;;  %v864_v15 = vcombine.high %v838_v6, %v846_v7  ;;  %v1952_v61 = vpop.f32.mrf.mxu0 }
 0x1cd   : > { %v665_v16 = vcombine.low %v637_v8, %v644_v9  ;;  %v1878_v17 = vcombine.high %v637_v8, %v644_v9  ;;  %v681_v18 = vcombine.low %v653_v10, %v660_v11  ;;  %v1879_v19 = vcombine.high %v653_v10, %v660_v11 }
 0x1ce   : > { %v855_v20 = vrot.slane %v847_v12, %v2697_v36  ;;  %v871_v22 = vrot.slane %v863_v13, %v2697_v36  ;;  %v862_v31 = vrot.slane %v848_v14, %v2697_v36  ;;  %v878_v32 = vrot.slane %v864_v15, %v2697_v36  ;;  %v584_v62 = vpop.f32.mrf.mxu0 }
 0x1cf   : > { %v672_v23 = vrot.slane %v665_v16, %v2694_v29  ;;  %v680_v24 = vrot.slane %v1878_v17, %v2694_v29  ;;  %v688_v26 = vrot.slane %v681_v18, %v2694_v29  ;;  %v696_v27 = vrot.slane %v1879_v19, %v2694_v29 }
 0x1d0   : > { %v879_v28 = vcombine.low %v855_v20, %v871_v22  ;;  %v880_v30 = vcombine.high %v855_v20, %v871_v22  ;;  %v881_v42 = vcombine.low %v862_v31, %v878_v32  ;;  %v882_v43 = vcombine.high %v862_v31, %v878_v32  ;;  %v1953_v63 = vpop.f32.mrf.mxu0 }
 0x1d1   : > { %v697_v33 = vcombine.low %v672_v23, %v680_v24  ;;  %v713_v34 = vcombine.low %v688_v26, %v696_v27  ;;  %v698_v44 = vcombine.high %v672_v23, %v680_v24  ;;  %v714_v45 = vcombine.high %v688_v26, %v696_v27 }
 0x1d2   : > { %v883_v35 = vpack.c.bf16 %v879_v28, %v879_v28  ;;  %v884_v37 = vpack.c.bf16 %v880_v30, %v880_v30  ;;  %v885_v48 = vpack.c.bf16 %v881_v42, %v881_v42  ;;  %v886_v49 = vpack.c.bf16 %v882_v43, %v882_v43 }
 0x1d3   : > { %v705_v38 = vrot.slane %v697_v33, %v2697_v36  ;;  %v721_v39 = vrot.slane %v713_v34, %v2697_v36  ;;  %v712_v52 = vrot.slane %v698_v44, %v2697_v36  ;;  %v728_v53 = vrot.slane %v714_v45, %v2697_v36 }
 0x1d4   : > { %v1042_v40 = vsel %vm1037_vm2, %v883_v35, 0  ;;  %v1088_v41 = vsel %vm1037_vm2, %v884_v37, 0  ;;  %v1134_v54 = vsel %vm1037_vm2, %v885_v48, 0  ;;  %v1180_v55 = vsel %vm1037_vm2, %v886_v49, 0 }
 0x1d5   : > { %1955 = vmatpush3.bf16.xpose.msra.mxu1 %v1042_v40  ;;  %1961 = vmatpush3.bf16.xpose.msra.mxu0 %v1088_v41  ;;  %v729_v46 = vcombine.low %v705_v38, %v721_v39  ;;  %v730_v47 = vcombine.high %v705_v38, %v721_v39  ;;  %v731_v56 = vcombine.low %v712_v52, %v728_v53  ;;  %v1231_v1 = vand.u32 127, %v602_v21 }
 0x1d6   : > { %1966 = vmatprep.subr.bf16.mxu1 %v2420_v0  ;;  %1972 = vmatprep.subr.bf16.mxu0 %v2420_v0  ;;  %v732_v57 = vcombine.high %v712_v52, %v728_v53 }
 0x1d7   : > { %v733_v50 = vpack.c.bf16 %v729_v46, %v729_v46  ;;  %v734_v51 = vpack.c.bf16 %v730_v47, %v730_v47  ;;  %v735_v58 = vpack.c.bf16 %v731_v56, %v731_v56  ;;  %vm1232_vm3 = vcmp.le.s32.totalorder %v1231_v1, %v2691_v25 }
 0x1d8   : > { %v736_v59 = vpack.c.bf16 %v732_v57, %v732_v57 }
 0x1dc   : > { %1957 = vmatmul.mubr.msk.bf16.vlgmr.msra.gmra.mxu1 %vm1037_vm2, %v733_v50  ;;  %1963 = vmatmul.mubr.msk.bf16.vlgmr.msra.gmra.mxu0 %vm1037_vm2, %v734_v51 }
 0x1dd   : > { %1967 = vmatpush3.bf16.xpose.msra.mxu1 %v1134_v54  ;;  %1973 = vmatpush3.bf16.xpose.msra.mxu0 %v1180_v55 }
 0x1de   : > { %1968 = vmatprep.mubr.msk.bf16.mxu1 %vm2421_vm0, %v2420_v0  ;;  %1974 = vmatprep.mubr.msk.bf16.mxu0 %vm2421_vm0, %v2420_v0 }
 0x1df   : > { %1978 = vmatprep.subr.bf16.mxu1 %v2420_v0  ;;  %1984 = vmatprep.subr.bf16.mxu0 %v2420_v0 }
 0x1e4   : > { %1969 = vmatmul.mubr.msk.bf16.vlgmr.msra.gmra.mxu1 %vm1037_vm2, %v735_v58  ;;  %1975 = vmatmul.mubr.msk.bf16.vlgmr.msra.gmra.mxu0 %vm1037_vm2, %v736_v59 }
 0x1e5   : > { %1980 = vmatprep.mubr.msk.bf16.mxu1 %vm2421_vm0, %v2420_v0  ;;  %1986 = vmatprep.mubr.msk.bf16.mxu0 %vm2421_vm0, %v2420_v0 }
 0x29c   : > { %v1078_v2 = vpop.f32.mrf.mxu1  ;;  %v1124_v3 = vpop.f32.mrf.mxu0 }
 0x29d   : > { %v1222_v4 = vmul.f32 0.35355338, %v1078_v2  ;;  %v1223_v5 = vmul.f32 0.35355338, %v1124_v3 }
 0x29e   : > { %v1958_v6 = vpop.f32.mrf.mxu1  ;;  %v1964_v7 = vpop.f32.mrf.mxu0 }
 0x29f   : > { %v1235_v8 = vsel %vm1232_vm3, %v1222_v4, -inf  ;;  %v1236_v9 = vsel %vm1232_vm3, %v1223_v5, -inf }
 0x2a0   : > { %v1081_v10 = vpop.f32.mrf.mxu1  ;;  %v1127_v11 = vpop.f32.mrf.mxu0  ;;  %v1239_v12 = vsel %vm1037_vm2, %v1235_v8, -inf  ;;  %v1242_v21 = vsel %vm1037_vm2, %v1236_v9, -inf }
 0x2a1   : > { %1240 = vmax.xlane.f32.xlu0 %v1239_v12  ;;  %1243 = vmax.xlane.f32.xlu1 %v1242_v21 }
 0x2a2   : > { %v1959_v13 = vpop.f32.mrf.mxu1  ;;  %v1965_v14 = vpop.f32.mrf.mxu0 }
 0x2a4   : > { %v1170_v15 = vpop.f32.mrf.mxu1  ;;  %v1216_v16 = vpop.f32.mrf.mxu0 }
 0x2a5   : > { %v1224_v17 = vmul.f32 0.35355338, %v1170_v15  ;;  %v1225_v18 = vmul.f32 0.35355338, %v1216_v16 }
 0x2a6   : > { %v1970_v19 = vpop.f32.mrf.mxu1  ;;  %v1976_v20 = vpop.f32.mrf.mxu0 }
 0x2a7   : > { %v1237_v22 = vsel %vm1232_vm3, %v1224_v17, -inf  ;;  %v1238_v27 = vsel %vm1232_vm3, %v1225_v18, -inf }
 0x2a8   : > { %v1173_v23 = vpop.f32.mrf.mxu1  ;;  %v1219_v24 = vpop.f32.mrf.mxu0  ;;  %v1245_v26 = vsel %vm1037_vm2, %v1237_v22, -inf  ;;  %v1248_v31 = vsel %vm1037_vm2, %v1238_v27, -inf }
 0x2a9   : > { %1246 = vmax.xlane.f32.xlu0 %v1245_v26 }
 0x2aa   : > { %v1971_v28 = vpop.f32.mrf.mxu1  ;;  %v1977_v30 = vpop.f32.mrf.mxu0 }
 0x2ad   : > { %1249 = vmax.xlane.f32.xlu0 %v1248_v31 }
 0x2b2   : > { %888 = vrot.lane.b32.xlu1 %v2751_v60, %s2423_s18 }
 0x32a   : > { %v1241_v32 = vpop.xlane.xlu0 %1240  ;;  %v1244_v33 = vpop.xlane.xlu1 %1243 }
 0x32b   : > { %v1251_v34 = vsub.f32 %v1235_v8, %v1241_v32  ;;  %v1252_v35 = vsub.f32 %v1236_v9, %v1244_v33 }
 0x32d   : > { %v1255_v37 = vmul.f32 1.442695, %v1251_v34  ;;  %v1257_v38 = vmul.f32 1.442695, %v1252_v35 }
 0x32e   : > { %v889_v52 = vpop.permute.xlu1 %888 }
 0x32f   : > { %2138 = vpow2.f32 %v1255_v37 }
 0x330   : > { %2140 = vpow2.f32 %v1257_v38 }
 0x332   : > { %v1247_v42 = vpop.xlane.xlu0 %1246 }
 0x333   : > { %v1253_v44 = vsub.f32 %v1237_v22, %v1247_v42 }
 0x335   : > { %v1259_v46 = vmul.f32 1.442695, %v1253_v44 }
 0x336   : > { %v1250_v43 = vpop.xlane.xlu0 %1249 }
 0x337   : > { %v1254_v45 = vsub.f32 %v1238_v27, %v1250_v43  ;;  %2142 = vpow2.f32 %v1259_v46 }
 0x339   : > { %v1261_v47 = vmul.f32 1.442695, %v1254_v45 }
 0x33b   : > { %2144 = vpow2.f32 %v1261_v47 }
 0x33c   : > { %v2769_v39 = vpop.eup %2138 }
 0x33d   : > { %v2771_v25 = vpop.eup %2140  ;;  %v1263_v40 = vsel %vm1037_vm2, %v2769_v39, 0.0 }
 0x33e   : > { %1264 = vadd.xlane.f32.xlu1 %v1263_v40  ;;  %v1266_v41 = vsel %vm1037_vm2, %v2771_v25, 0.0 }
 0x33f   : > { %1267 = vadd.xlane.f32.xlu0 %v1266_v41 }
 0x344   : > { %v2781_v48 = vpop.eup %2142 }
 0x345   : > { %v1269_v50 = vsel %vm1037_vm2, %v2781_v48, 0.0 }
 0x348   : > { %v2783_v49 = vpop.eup %2144 }
 0x349   : > { %v1272_v51 = vsel %vm1037_vm2, %v2783_v49, 0.0 }
 0x34f   : > { %894 = vrot.lane.b32.xlu1 %v2751_v60, %s2422_s30  ;;  %s2320_s30 = scalar_lea.vmem %s2319_s8, 256 }
 0x350   : > { %p2322_p13 = scmp.lt.s32.totalorder %s2320_s30, %s2314_s27 }
 0x352   : > { %p2323_p4 = por %p2322_p13, %p2321_p11 }
 0x354   : > { %p2324_p1 = pnand %p2323_p4, %p2317_p5 }
 0x355   : > { %891 = vrot.lane.b32.xlu0 %v2751_v60, %s2424_s19 }
 0x373   : > { %1270 = vadd.xlane.f32.xlu1 %v1269_v50 }
 0x374   : > { %1273 = vadd.xlane.f32.xlu0 %v1272_v51 }
 0x3c7   : > { %v1265_v53 = vpop.xlane.xlu1 %1264 }
 0x3c8   : > { %v1268_v54 = vpop.xlane.xlu0 %1267  ;;  %2146 = vrcp.f32 %v1265_v53 }
 0x3c9   : > { %2148 = vrcp.f32 %v1268_v54 }
 0x3cb   : > { %v895_v55 = vpop.permute.xlu1 %894 }
 0x3cc   : > { %v913_v56 = vcombine.low %v889_v52, %v895_v55  ;;  %v914_v57 = vcombine.high %v889_v52, %v895_v55  ;;  %v892_v58 = vpop.permute.xlu0 %891 }
 0x3cd   : > { %v897_v59 = vcombine.low %v2751_v60, %v892_v58  ;;  %v898_v61 = vcombine.high %v2751_v60, %v892_v58 }
 0x3ce   : > { %v921_v62 = vrot.slane %v913_v56, %v2694_v29  ;;  %v928_v63 = vrot.slane %v914_v57, %v2694_v29 }
 0x3cf   : > { %v905_v1 = vrot.slane %v897_v59, %v2694_v29  ;;  %v912_v2 = vrot.slane %v898_v61, %v2694_v29 }
 0x3d1   : > { %v929_v3 = vcombine.low %v905_v1, %v921_v62  ;;  %v930_v4 = vcombine.high %v905_v1, %v921_v62  ;;  %v945_v5 = vcombine.low %v912_v2, %v928_v63  ;;  %v946_v6 = vcombine.high %v912_v2, %v928_v63 }
 0x3d3   : > { %v937_v7 = vrot.slane %v929_v3, %v2697_v36  ;;  %v944_v8 = vrot.slane %v930_v4, %v2697_v36  ;;  %v953_v60 = vrot.slane %v945_v5, %v2697_v36  ;;  %v960_v9 = vrot.slane %v946_v6, %v2697_v36 }
 0x3d5   : > { %v965_v10 = vcombine.low %v937_v7, %v944_v8  ;;  %v1882_v11 = vcombine.high %v937_v7, %v944_v8  ;;  %v981_v12 = vcombine.low %v953_v60, %v960_v9  ;;  %v1883_v21 = vcombine.high %v953_v60, %v960_v9  ;;  %v2147_v22 = vpop.eup %2146 }
 0x3d6   : > { %v2149_v28 = vpop.eup %2148  ;;  %v1279_v37 = vmul.f32 %v2147_v22, %v2769_v39 }
 0x3d7   : > { %v972_v13 = vrot.slane %v965_v10, %v2694_v29  ;;  %v980_v14 = vrot.slane %v1882_v11, %v2694_v29  ;;  %v988_v15 = vrot.slane %v981_v12, %v2694_v29  ;;  %v996_v16 = vrot.slane %v1883_v21, %v2694_v29 }
 0x3d8   : > { %v1280_v38 = vmul.f32 %v2149_v28, %v2771_v25  ;;  %v1283_v44 = vpack.c.bf16 %v1279_v37, %v1279_v37 }
 0x3d9   : > { %v997_v17 = vcombine.low %v972_v13, %v980_v14  ;;  %v1013_v18 = vcombine.low %v988_v15, %v996_v16  ;;  %v998_v19 = vcombine.high %v972_v13, %v980_v14  ;;  %v1014_v20 = vcombine.high %v988_v15, %v996_v16 }
 0x3da   : > { %v1284_v45 = vpack.c.bf16 %v1280_v38, %v1280_v38 }
 0x3db   : > { %v1005_v23 = vrot.slane %v997_v17, %v2697_v36  ;;  %v1021_v24 = vrot.slane %v1013_v18, %v2697_v36  ;;  %v1012_v26 = vrot.slane %v998_v19, %v2697_v36  ;;  %v1028_v27 = vrot.slane %v1014_v20, %v2697_v36  ;;  %v2136_v17 = vld [vmem:[#allocation11 + $0x8] sm:$0xff]  }
 0x3dd   : > { %v1029_v30 = vcombine.low %v1005_v23, %v1021_v24  ;;  %v1030_v31 = vcombine.high %v1005_v23, %v1021_v24  ;;  %v1031_v32 = vcombine.low %v1012_v26, %v1028_v27  ;;  %v1032_v33 = vcombine.high %v1012_v26, %v1028_v27 }
 0x3df   : > { %v1033_v34 = vpack.c.bf16 %v1029_v30, %v1029_v30  ;;  %v1034_v35 = vpack.c.bf16 %v1030_v31, %v1030_v31  ;;  %v1035_v42 = vpack.c.bf16 %v1031_v32, %v1031_v32  ;;  %v1036_v43 = vpack.c.bf16 %v1032_v33, %v1032_v33  ;;  %v2137_v30 = vld [vmem:[#allocation11] sm:$0xff]  }
 0x3e1   : > { %v1292_v40 = vsel %vm1290_vm4, %v1033_v34, 0  ;;  %v1338_v41 = vsel %vm1290_vm4, %v1034_v35, 0  ;;  %v1384_v39 = vsel %vm1290_vm4, %v1035_v42, 0  ;;  %v1430_v25 = vsel %vm1290_vm4, %v1036_v43, 0 }
 0x3e2   : > { %1979 = vmatpush3.bf16.msra.mxu1 %v1292_v40  ;;  %1985 = vmatpush3.bf16.msra.mxu0 %v1338_v41 }
 0x3e3   : > { %1990 = vmatprep.subr.bf16.mxu1 %v2420_v0  ;;  %1996 = vmatprep.subr.bf16.mxu0 %v2420_v0 }
 0x3e5   : > { %1981 = vmatmul.mubr.msk.bf16.vlgmr.msra.gmra.mxu1 %vm1037_vm2, %v1283_v44  ;;  %1987 = vmatmul.mubr.msk.bf16.vlgmr.msra.gmra.mxu0 %vm1037_vm2, %v1284_v45 }
 0x3e6   : > { %1991 = vmatpush3.bf16.msra.mxu1 %v1384_v39  ;;  %1997 = vmatpush3.bf16.msra.mxu0 %v1430_v25 }
 0x3e7   : > { %1992 = vmatprep.mubr.msk.bf16.mxu1 %vm2421_vm0, %v2420_v0  ;;  %1998 = vmatprep.mubr.msk.bf16.mxu0 %vm2421_vm0, %v2420_v0 }
 0x3e8   : > { %2002 = vmatprep.subr.bf16.mxu1 %v2420_v0 }
 0x3fc   : > { %v1271_v46 = vpop.xlane.xlu1 %1270 }
 0x3fd   : > { %2150 = vrcp.f32 %v1271_v46  ;;  %v1274_v47 = vpop.xlane.xlu0 %1273 }
 0x3fe   : > { %2152 = vrcp.f32 %v1274_v47 }
 0x40a   : > { %v2151_v50 = vpop.eup %2150 }
 0x40b   : > { %v2153_v51 = vpop.eup %2152  ;;  %v1281_v52 = vmul.f32 %v2151_v50, %v2781_v48 }
 0x40c   : > { %v1282_v53 = vmul.f32 %v2153_v51, %v2783_v49 }
 0x40d   : > { %v1285_v54 = vpack.c.bf16 %v1281_v52, %v1281_v52 }
 0x40e   : > { %v1286_v55 = vpack.c.bf16 %v1282_v53, %v1282_v53  ;;  %v1894_v53 = vld [vmem:[%s2910_s6] ss:$0 sm:$0xff] }
 0x40f   : > { %1993 = vmatmul.mubr.msk.bf16.vlgmr.msra.gmra.mxu1 %vm1037_vm2, %v1285_v54 }
 0x410   : > { %1999 = vmatmul.mubr.msk.bf16.vlgmr.msra.gmra.mxu0 %vm1037_vm2, %v1286_v55  ;;  %2006 = vmatprep.mubr.msk.bf16.mxu1 %vm2421_vm0, %v2420_v0 }
 0x411   : > { %2003 = vmatpush3.bf16.msra.mxu1 %v2136_v17 }
 0x412   : > { %2004 = vmatprep.subr.bf16.mxu1 %v2420_v0 }
 0x415   : > { %2005 = vmatpush3.bf16.msra.mxu1 %v2137_v30 }
 0x4a5   : > { %v1328_v56 = vpop.f32.mrf.mxu1  ;;  %v1374_v57 = vpop.f32.mrf.mxu0 }
 0x4a7   : > { %v1982_v58 = vpop.f32.mrf.mxu1  ;;  %v1988_v59 = vpop.f32.mrf.mxu0 }
 0x4a9   : > { %v1331_v61 = vpop.f32.mrf.mxu1  ;;  %v1377_v62 = vpop.f32.mrf.mxu0 }
 0x4ab   : > { %v1983_v63 = vpop.f32.mrf.mxu1  ;;  %v1989_v1 = vpop.f32.mrf.mxu0 }
 0x4cf   : > { %v1420_v48 = vpop.f32.mrf.mxu1 }
 0x4d0   : > { %v1472_v2 = vcombine.low %v1328_v56, %v1420_v48  ;;  %v1473_v49 = vcombine.high %v1328_v56, %v1420_v48  ;;  %v1466_v3 = vpop.f32.mrf.mxu0 }
 0x4d1   : > { %v1488_v4 = vcombine.low %v1374_v57, %v1466_v3  ;;  %v1489_v5 = vcombine.high %v1374_v57, %v1466_v3  ;;  %v1994_v6 = vpop.f32.mrf.mxu1 }
 0x4d2   : > { %v1480_v7 = vrot.slane %v1472_v2, %v2694_v29  ;;  %v1487_v8 = vrot.slane %v1473_v49, %v2694_v29  ;;  %v2000_v60 = vpop.f32.mrf.mxu0 }
 0x4d3   : > { %v1496_v9 = vrot.slane %v1488_v4, %v2694_v29  ;;  %v1503_v10 = vrot.slane %v1489_v5, %v2694_v29  ;;  %v1423_v11 = vpop.f32.mrf.mxu1 }
 0x4d4   : > { %v1469_v12 = vpop.f32.mrf.mxu0 }
 0x4d5   : > { %v1504_v21 = vcombine.low %v1480_v7, %v1496_v9  ;;  %v1505_v13 = vcombine.high %v1480_v7, %v1496_v9  ;;  %v1520_v14 = vcombine.low %v1487_v8, %v1503_v10  ;;  %v1521_v15 = vcombine.high %v1487_v8, %v1503_v10  ;;  %v1995_v16 = vpop.f32.mrf.mxu1 }
 0x4d6   : > { %v2001_v18 = vpop.f32.mrf.mxu0 }
 0x4d7   : > { %v1512_v19 = vrot.slane %v1504_v21, %v2697_v36  ;;  %v1519_v20 = vrot.slane %v1505_v13, %v2697_v36  ;;  %v1528_v22 = vrot.slane %v1520_v14, %v2697_v36  ;;  %v1535_v23 = vrot.slane %v1521_v15, %v2697_v36 }
 0x4d9   : > { %v1540_v24 = vcombine.low %v1512_v19, %v1519_v20  ;;  %v1892_v26 = vcombine.high %v1512_v19, %v1519_v20  ;;  %v1556_v27 = vcombine.low %v1528_v22, %v1535_v23  ;;  %v1893_v28 = vcombine.high %v1528_v22, %v1535_v23 }
 0x4db   : > { %v1547_v31 = vrot.slane %v1540_v24, %v2694_v29  ;;  %v1555_v32 = vrot.slane %v1892_v26, %v2694_v29  ;;  %v1563_v33 = vrot.slane %v1556_v27, %v2694_v29  ;;  %v1571_v34 = vrot.slane %v1893_v28, %v2694_v29 }
 0x4dd   : > { %v1573_v35 = vcombine.high %v1547_v31, %v1555_v32  ;;  %v1589_v37 = vcombine.high %v1563_v33, %v1571_v34  ;;  %v1572_v38 = vcombine.low %v1547_v31, %v1555_v32  ;;  %v1588_v40 = vcombine.low %v1563_v33, %v1571_v34 }
 0x4df   : > { %v1587_v0 = vrot.slane %v1573_v35, %v2697_v36  ;;  %v1603_v41 = vrot.slane %v1589_v37, %v2697_v36  ;;  %v1580_v42 = vrot.slane %v1572_v38, %v2697_v36  ;;  %v1596_v43 = vrot.slane %v1588_v40, %v2697_v36 }
 0x4e1   : > { %v1606_v44 = vcombine.low %v1587_v0, %v1603_v41  ;;  %v1605_v45 = vcombine.high %v1580_v42, %v1596_v43  ;;  %v1604_v39 = vcombine.low %v1580_v42, %v1596_v43  ;;  %v1607_v29 = vcombine.high %v1587_v0, %v1603_v41 }
 0x4e3   : > { %1613 = vrot.lane.b32.xlu1 %v1606_v44, %s2427_s17  ;;  %1609 = vrot.lane.b32.xlu0 %v1605_v45, %s2428_s12 }
 0x4e7   : > { %1617 = vrot.lane.b32.xlu1 %v1607_v29, %s2429_s13 }
 0x555   : > { %v1614_v25 = vpop.permute.xlu1 %1613  ;;  %v1610_v46 = vpop.permute.xlu0 %1609 }
 0x556   : > { %v1620_v47 = vsel %vm1037_vm2, %v1604_v39, %v1610_v46 }
 0x557   : > { %v1622_v36 = vsel %vm1621_vm5, %v1620_v47, %v1614_v25 }
 0x559   : > { %v1618_v50 = vpop.permute.xlu1 %1617 }
 0x55a   : > { %v1624_v51 = vsel %vm1623_vm6, %v1622_v36, %v1618_v50 }
 0x55b   : > { %v1625_v52 = vpack.c.bf16 %v1624_v51, %v1624_v51 }
 0x55d   : > { %2007 = vmatmul.mubr.msk.bf16.vlgmr.msra.gmra.mxu1 %vm428_vm1, %v1625_v52 }
 0x61d   : > { %v1686_v54 = vpop.f32.mrf.mxu1 }
 0x61e   : > { %v1687_v55 = vadd.f32 %v1894_v53, %v1686_v54 }
 0x61f   : > { %v2008_v56 = vpop.f32.mrf.mxu1 }
 0x620   : > { %1692 = vst.msk [vmem:[%s405_s22] sm:$0xff] %vm428_vm1, %v1687_v55 }
 0x621   : > { %v1689_v57 = vpop.f32.mrf.mxu1 }
 0x622   : > { %2327 = shalt.err (!%p2324_p1)
}
 0x623   : > { %s2328_s18 = scalar_lea.hbm %s2855_s3, 128  ;;  %s2332_s17 = scalar_lea.hbm %s2911_s7, 256 }
 0x624   : > { %p2329_p3 = scmp.ne.s32.totalorder %s2855_s3, %s2328_s18  ;;  %p2333_p7 = scmp.lt.s32.totalorder %s2855_s3, %s2911_s7 }
 0x625   : > { %p2334_p12 = scmp.lt.s32.totalorder %s2332_s17, %s2328_s18 }
 0x626   : > { %p2330_p9 = pnand %p2329_p3, %p2589_p2 }
 0x627   : > { %p2335_p0 = por %p2334_p12, %p2333_p7 }
 0x628   : > { %p2331_p10 = pneg %p2330_p9 }
 0x62a   : > { %p2336_p6 = pnand %p2335_p0, %p2331_p10 }
 0x62c   : > { %2339 = shalt.err (!%p2336_p6)
}
 0x62d   : > { %2030 = dma.vmem_to_hbm [thread:$0]  (%p2589_p2), %s2857_s15, 128, %s2855_s3, %s1694_s4   ;;  %v2009_v58 = vpop.f32.mrf.mxu1 }
 0x62e PF: > { %s1720_s11 = sand.u32 1, %s2390_s24   ;;  %p2936_p5 = scmp.ge.s32.totalorder %s2410_s29, 2 }
 0x62f   : > { %s1721_s21 = scalar_lea.sflag [#allocation4], %s1720_s11 }
 0x630   : > { %p2053_p11 = pnand %p2936_p5, %p2596_p8 }
 0x632   : > { %p2054_p13 = pneg %p2053_p11 }
 0x634   : > { %2385 = dma.done.wait (%p2054_p13), %s1721_s21, 128  }
 0x635   : > { %2387 = vsyncadd (%p2054_p13), %s1721_s21, 4294967168  ;;  %s28_s29 = sadd.s32 1, %s2410_s29   ;;  %s2937_s24 = smov %s2394_s25 }
 0x636   : > { %p25_p4 = scmp.ge.s32.totalorder %s28_s29, 4   ;;  %s2938_s25 = smov %s2398_s26 }
 0x637   : > { %s2939_s26 = smov %s2594_s9  ;;  %s2940_s27 = smov %s2406_s28 }
 0x638   : > { %s2941_s28 = smov %s2943_s20  ;;  %27 = sbr.rel (!%p25_p4) target bundleno = 16 (0x10), region = 122 }
 0x63d   :  { %1726 = vsyncpa [#allocation3], 1 }
 0x63e   :  { %1728 = vsyncpa [#allocation3 + $0x1], 1 }
 0x63f   :  { %1729 = vsyncpa [#allocation6], 1 }
 0x640   :  { %1731 = vsyncpa [#allocation6 + $0x1], 1 }
 0x641   :  { %1732 = vsyncpa [#allocation9], 1 }
 0x642   :  { %1733 = vsyncpa [#allocation12], 1 }
 0x643   :  { %1734 = vsyncpa [#allocation4], 1 }
 0x644   :  { %1736 = vsyncpa [#allocation4 + $0x1], 1 }

</bundles_post_ra>
